<compile_context>
chip_gen: v7x
topology: tpu7x:2x2x1
jax: 0.10.0
libtpu: 0.0.40
codegen_flags: <defaults>
</compile_context>

<pallas_src>
import jax
import jax.numpy as jnp
from jax.experimental import pallas as pl
from jax.experimental.pallas import tpu as pltpu

HIDDEN = 128
LANE = 128
SUBLANE = 8


def policy_kernel(x_ref, w1_ref, b1_ref, w2_ref, b2_ref, out_ref):
    x = x_ref[...]                                                         # [B, S]
    h = jnp.dot(x, w1_ref[...], preferred_element_type=jnp.float32)       # [B, 128]   (MXU)
    h = jnp.maximum(h + b1_ref[...], 0.0)                                 # bias + ReLU (VPU)
    logits = jnp.dot(h, w2_ref[...], preferred_element_type=jnp.float32)  # [B, A_pad] (MXU)
    logits = logits + b2_ref[...]                                         # padded cols -> ~-inf
    # numerically-stable softmax over the last dim (== torch F.softmax(x, dim=1) for 2-D)
    m = jnp.max(logits, axis=-1, keepdims=True)
    e = jnp.exp(logits - m)                                               # padded cols -> 0
    denom = jnp.sum(e, axis=-1, keepdims=True)
    probs = e / denom                                                     # exact division
    a = out_ref.shape[-1]                                                 # true action dim
    out_ref[...] = probs[:, :a].astype(out_ref.dtype)                     # narrow store


def prepare_params(w1, b1, w2, b2):
    """One-time parameter prep (hoisted off the hot path).

    fc2 weight/bias are padded to a lane-dense multiple of 128 so the second matmul has a
    full-lane RHS; padded logit columns get a ~-inf bias so exp() maps them to exactly 0.
    """
    H, A = w2.shape
    a_pad = ((A + LANE - 1) // LANE) * LANE
    w2p = jnp.pad(w2, ((0, 0), (0, a_pad - A)))
    b2p = jnp.pad(b2.reshape(1, A), ((0, 0), (0, a_pad - A)), constant_values=-1e30)
    return (w1, b1.reshape(1, H), w2p, b2p, A)


def policy_forward(x, params, *, max_batch_tile=2048, small_batch=256):
    w1, b1, w2p, b2p, A = params
    B, S = x.shape
    H = w1.shape[1]
    A_pad = w2p.shape[1]

    if B <= small_batch:
        # Tiny batch: grid-free call, everything resident in VMEM, narrow (B, A) output.
        return pl.pallas_call(
            policy_kernel,
            out_shape=jax.ShapeDtypeStruct((B, A), jnp.float32),
            in_specs=[pl.BlockSpec(memory_space=pltpu.MemorySpace.VMEM)] * 5,
            out_specs=pl.BlockSpec(memory_space=pltpu.MemorySpace.VMEM),
        )(x, w1, b1, w2p, b2p)

    # Tiled path: even number of tiles (balanced across both v7x TensorCores), sublane-aligned
    # tile size, capped so the per-tile working set stays at a few MiB on every generation.
    n_tiles = max(2, 2 * (-(-B // (2 * max_batch_tile))))
    tb = -(-B // n_tiles)                                   # ceil div
    tb = ((tb + SUBLANE - 1) // SUBLANE) * SUBLANE          # multiple of 8
    b_pad = n_tiles * tb
    xp = jnp.pad(x, ((0, b_pad - B), (0, 0))) if b_pad != B else x

    out = pl.pallas_call(
        policy_kernel,
        out_shape=jax.ShapeDtypeStruct((b_pad, A), jnp.float32),
        grid=(n_tiles,),
        in_specs=[
            pl.BlockSpec((tb, S), lambda i: (i, 0)),        # batch-tiled activations
            pl.BlockSpec((S, H), lambda i: (0, 0)),         # weights VMEM-resident across grid
            pl.BlockSpec((1, H), lambda i: (0, 0)),
            pl.BlockSpec((H, A_pad), lambda i: (0, 0)),
            pl.BlockSpec((1, A_pad), lambda i: (0, 0)),
        ],
        out_specs=pl.BlockSpec((tb, A), lambda i: (i, 0)),  # narrow, true-A output
        compiler_params=pltpu.CompilerParams(
            dimension_semantics=("parallel",),              # megacore sharding on v7x
        ),
    )(xp, w1, b1, w2p, b2p)
    return out[:B] if b_pad != B else out


def init_params(key, state_dim, action_dim, hidden=HIDDEN):
    # Deterministic init mimicking PyTorch nn.Linear default: U(-1/sqrt(fan_in), 1/sqrt(fan_in))
    k1, k2, k3, k4 = jax.random.split(key, 4)
    bound1 = 1.0 / (state_dim ** 0.5)
    bound2 = 1.0 / (hidden ** 0.5)
    w1 = jax.random.uniform(k1, (state_dim, hidden), jnp.float32, -bound1, bound1)
    b1 = jax.random.uniform(k2, (1, hidden), jnp.float32, -bound1, bound1)
    w2 = jax.random.uniform(k3, (hidden, action_dim), jnp.float32, -bound2, bound2)
    b2 = jax.random.uniform(k4, (1, action_dim), jnp.float32, -bound2, bound2)
    return w1, b1, w2, b2


def reference_forward(x, w1, b1, w2, b2):
    h = jnp.maximum(x @ w1 + b1, 0.0)
    logits = h @ w2 + b2
    return jax.nn.softmax(logits, axis=1)


if __name__ == "__main__":
    key = jax.random.PRNGKey(0)
    kx, kp, kx2 = jax.random.split(key, 3)

    batch, state_dim, action_dim = 8, 4, 2
    x = jax.random.normal(kx, (batch, state_dim), jnp.float32)
    w1, b1, w2, b2 = init_params(kp, state_dim, action_dim)
    params = prepare_params(w1, b1, w2, b2)       # one-time pad, off the hot path

    # Small batch -> grid-free whole-array-VMEM path.
    out = jax.block_until_ready(policy_forward(x, params))
    ref = reference_forward(x, w1, b1, w2, b2)
    assert out.shape == (batch, action_dim)
    assert jnp.allclose(out, ref, atol=1e-3, rtol=1e-3), "mismatch vs reference (small batch)"
    assert jnp.allclose(jnp.sum(out, axis=1), 1.0, atol=1e-4), "softmax rows must sum to ~1"

    # Larger batch -> batch-tiled grid path (weights VMEM-resident, even parallel tile count).
    big_batch = 1500  # deliberately not a multiple of 8 to exercise batch padding
    xb = jax.random.normal(kx2, (big_batch, state_dim), jnp.float32)
    out_b = jax.block_until_ready(policy_forward(xb, params))
    ref_b = reference_forward(xb, w1, b1, w2, b2)
    assert out_b.shape == (big_batch, action_dim)
    assert jnp.allclose(out_b, ref_b, atol=1e-3, rtol=1e-3), "mismatch vs reference (tiled batch)"
    assert jnp.allclose(jnp.sum(out_b, axis=1), 1.0, atol=1e-4), "softmax rows must sum to ~1"

    print("KERNEL_OK")
</pallas_src>

<mosaic_0001>
module attributes {stable_mosaic.version = 11 : i64} {
  func.func @policy_kernel(%arg0: memref<8x4xf32, #tpu.memory_space<vmem>>, %arg1: memref<4x128xf32, #tpu.memory_space<vmem>>, %arg2: memref<1x128xf32, #tpu.memory_space<vmem>>, %arg3: memref<128x128xf32, #tpu.memory_space<vmem>>, %arg4: memref<1x128xf32, #tpu.memory_space<vmem>>, %arg5: memref<8x2xf32, #tpu.memory_space<vmem>>) attributes {dimension_semantics = [], scalar_prefetch = 0 : i64, scratch_operands = 0 : i64, tpu.core_type = #tpu.core_type<tc>} {
    %c0 = arith.constant 0 : index
    %c0_0 = arith.constant 0 : index
    %0 = vector.load %arg0[%c0, %c0_0] : memref<8x4xf32, #tpu.memory_space<vmem>>, vector<8x4xf32>
    %c0_1 = arith.constant 0 : index
    %c0_2 = arith.constant 0 : index
    %1 = vector.load %arg1[%c0_1, %c0_2] : memref<4x128xf32, #tpu.memory_space<vmem>>, vector<4x128xf32>
    %cst = arith.constant dense<0.000000e+00> : vector<8x128xf32>
    %2 = tpu.matmul %0, %1, %cst {dimension_numbers = #tpu.dot_dimension_numbers<[1], [0], [0], [1], [0, 0, 1, 1], [], []>} : vector<8x4xf32>, vector<4x128xf32>, vector<8x128xf32> -> vector<8x128xf32>
    %c0_3 = arith.constant 0 : index
    %c0_4 = arith.constant 0 : index
    %3 = vector.load %arg2[%c0_3, %c0_4] : memref<1x128xf32, #tpu.memory_space<vmem>>, vector<1x128xf32>
    %4 = vector.broadcast %3 : vector<1x128xf32> to vector<8x128xf32>
    %5 = arith.addf %2, %4 : vector<8x128xf32>
    %cst_5 = arith.constant 0.000000e+00 : f32
    %6 = vector.broadcast %cst_5 : f32 to vector<8x128xf32>
    %7 = arith.maximumf %5, %6 : vector<8x128xf32>
    %c0_6 = arith.constant 0 : index
    %c0_7 = arith.constant 0 : index
    %8 = vector.load %arg3[%c0_6, %c0_7] : memref<128x128xf32, #tpu.memory_space<vmem>>, vector<128x128xf32>
    %cst_8 = arith.constant dense<0.000000e+00> : vector<8x128xf32>
    %9 = tpu.matmul %7, %8, %cst_8 {dimension_numbers = #tpu.dot_dimension_numbers<[1], [0], [0], [1], [0, 0, 1, 1], [], []>} : vector<8x128xf32>, vector<128x128xf32>, vector<8x128xf32> -> vector<8x128xf32>
    %c0_9 = arith.constant 0 : index
    %c0_10 = arith.constant 0 : index
    %10 = vector.load %arg4[%c0_9, %c0_10] : memref<1x128xf32, #tpu.memory_space<vmem>>, vector<1x128xf32>
    %11 = vector.broadcast %10 : vector<1x128xf32> to vector<8x128xf32>
    %12 = arith.addf %9, %11 : vector<8x128xf32>
    %cst_11 = arith.constant dense<0xFF800000> : vector<8xf32>
    %13 = vector.multi_reduction <maximumf>, %12, %cst_11 [1] : vector<8x128xf32> to vector<8xf32>
    %14 = vector.shape_cast %13 : vector<8xf32> to vector<8x1xf32>
    %15 = vector.broadcast %14 : vector<8x1xf32> to vector<8x128xf32>
    %16 = arith.subf %12, %15 : vector<8x128xf32>
    %17 = math.exp %16 : vector<8x128xf32>
    %cst_12 = arith.constant dense<0.000000e+00> : vector<8xf32>
    %18 = vector.multi_reduction <add>, %17, %cst_12 [1] : vector<8x128xf32> to vector<8xf32>
    %19 = vector.shape_cast %18 : vector<8xf32> to vector<8x1xf32>
    %20 = vector.broadcast %19 : vector<8x1xf32> to vector<8x128xf32>
    %21 = arith.divf %17, %20 : vector<8x128xf32>
    %22 = vector.extract_strided_slice %21 {offsets = [0, 0], sizes = [8, 2], strides = [1, 1]} : vector<8x128xf32> to vector<8x2xf32>
    %c0_13 = arith.constant 0 : index
    %c0_14 = arith.constant 0 : index
    %23 = vector.load %arg5[%c0_13, %c0_14] : memref<8x2xf32, #tpu.memory_space<vmem>>, vector<8x2xf32>
    tpu.vector_store %arg5[%c0_13, %c0_14], %22 {strides = array<i32>} : memref<8x2xf32, #tpu.memory_space<vmem>>, vector<8x2xf32>,
    return
  }
}

</mosaic_0001>

<bundles_post_ra>
// kernel: tpu_custom_call.1
= control target key start
LH: loop header
LB: loop body
LE: loop exit
PB: predicated region body
PF: predicated region fallthrough
CT: control target
= control target key end

     0   :  { %10 = vsyncpa [#allocation3], 0  ;;  %s352_s18 = smov [#allocation2]   ;;  %s415_s0 = inlined_call_operand.vmem [shape: f32[8,4], index: 0, kind: input, shape index: {}]   ;;  %s416_s1 = inlined_call_operand.vmem [shape: f32[4,128], index: 1, kind: input, shape index: {}]   ;;  %s417_s2 = inlined_call_operand.vmem [shape: f32[1,128], index: 2, kind: input, shape index: {}]   ;;  %s418_s3 = inlined_call_operand.hbm [shape: f32[128,128], index: 3, kind: input, shape index: {}]   ;;  %s419_s4 = inlined_call_operand.vmem [shape: f32[1,128], index: 4, kind: input, shape index: {}]   ;;  %s420_s5 = inlined_call_operand.vmem [shape: f32[8,2], index: 5, kind: output, shape index: {}]  }
   0x1   :  { %s22_s19 = sshll.u32 %s352_s18, 4  ;;  %s328_s22 = scalar_lea.hbm %s418_s3, 2048  ;;  %s23_s19 = int_to_ptr.vmem [resolvable:$true] %s22_s19 }
   0x2   :  { %p329_p0 = scmp.ne.s32.totalorder %s418_s3, %s328_s22  ;;  %p332_p1 = scmp.lt.u32.totalorder %s328_s22, %s418_s3 }
   0x4   :  { %p334_p2 = pnand %p332_p1, %p329_p0 }
   0x6   :  { %337 = shalt.err (!%p334_p2)
}
   0x7   :  { %s338_s27 = scalar_lea.vmem %s23_s19, 2048  ;;  %p343_p4 = scmp.lt.s32.totalorder %s23_s19, %s23_s19 }
   0x8   :  { %p339_p3 = scmp.ne.s32.totalorder %s23_s19, %s338_s27  ;;  %p344_p5 = scmp.lt.s32.totalorder %s338_s27, %s338_s27 }
   0xa   :  { %p345_p6 = por %p344_p5, %p343_p4 }
   0xc   :  { %p346_p7 = pnand %p345_p6, %p339_p3 }
   0xe   :  { %349 = shalt.err (!%p346_p7)
}
   0xf   :  { %s353_s28 = smov 128   ;;  %s354_s29 = smov 8  }
  0x10   :  { %28 = dma.hbm_to_vmem [thread:$0]  %s418_s3, 2048, %s23_s19, [#allocation3], %s353_s28, %s353_s28, %s354_s29  }
  0x11   :  { %350 = dma.done.wait [#allocation3], 2048  }
  0x12   :  { %351 = vsyncadd [#allocation3], 4294965248  ;;  %v355_v0 = vmov 0.0   ;;  %vm356_vm0 = vmmov 0   ;;  %v357_v1 = vmov 0.0|0.0   ;;  %vm47_vm1 = vcmask 1043456  }
  0x13   :  { %254 = vmatprep.subr.mxu0 %v355_v0  ;;  %256 = vmatprep.mubr.msk.f32.mxu0 %vm356_vm0, %v355_v0  ;;  %vm43_vm2 = vcmask 31744   ;;  %v35_v2 = vld [vmem:[%s416_s1] sm:$0xf]  ;;  %v123_v5 = vld [vmem:[#allocation2 + $0x8] sm:$0xff]  ;;  %v124_v6 = vld [vmem:[#allocation2 + $0x10] sm:$0xff]  ;;  %vm224_vm3 = vcmask 15360  }
  0x14   :  { %294 = vmatprep.subr.bf16.mxu1 %v357_v1  ;;  %291 = vmatprep.mubr.msk.f32.mxu1 %vm356_vm0, %v355_v0  ;;  %v34_v3 = vld [vmem:[%s415_s0] sm:$0xff]  ;;  %v125_v7 = vld [vmem:[#allocation2 + $0x18] sm:$0xff]  ;;  %v127_v11 = vld [vmem:[#allocation2 + $0x28] sm:$0xff] }
  0x15   :  { %v122_v4 = vld [vmem:[#allocation2] sm:$0xff]  ;;  %255 = vmatpush3.msk.msra.mxu0 %vm47_vm1, %v35_v2  ;;  %v298_v9 = vpack.c.bf16 %v125_v7, %v124_v6  ;;  %v128_v13 = vld [vmem:[#allocation2 + $0x30] sm:$0xff]  ;;  %v129_v14 = vld [vmem:[#allocation2 + $0x38] sm:$0xff] }
  0x16   :  { %257 = vmatmul.mubr.msk.f32.vlgmr.msra.gmra.mrb[0].mxu0 %vm43_vm2, %v34_v3  ;;  %v295_v8 = vpack.c.bf16 %v123_v5, %v122_v4  ;;  %v126_v10 = vld [vmem:[#allocation2 + $0x20] sm:$0xff]  ;;  %v304_v15 = vpack.c.bf16 %v129_v14, %v128_v13  ;;  %v131_v17 = vld [vmem:[#allocation2 + $0x48] sm:$0xff]  ;;  %v132_v19 = vld [vmem:[#allocation2 + $0x50] sm:$0xff] }
  0x17   :  { %v301_v12 = vpack.c.bf16 %v127_v11, %v126_v10  ;;  %v130_v16 = vld [vmem:[#allocation2 + $0x40] sm:$0xff]  ;;  %v133_v20 = vld [vmem:[#allocation2 + $0x58] sm:$0xff]  ;;  %v135_v23 = vld [vmem:[#allocation2 + $0x68] sm:$0xff] }
  0x18   :  { %296 = vmatpush3.bf16.msra.mxu1 %v295_v8  ;;  %v307_v18 = vpack.c.bf16 %v131_v17, %v130_v16  ;;  %v310_v21 = vpack.c.bf16 %v133_v20, %v132_v19  ;;  %v134_v22 = vld [vmem:[#allocation2 + $0x60] sm:$0xff]  ;;  %v136_v25 = vld [vmem:[#allocation2 + $0x70] sm:$0xff]  ;;  %v137_v26 = vld [vmem:[#allocation2 + $0x78] sm:$0xff] }
  0x19   :  { %297 = vmatprep.subr.bf16.mxu1 %v357_v1  ;;  %v313_v24 = vpack.c.bf16 %v135_v23, %v134_v22  ;;  %v316_v27 = vpack.c.bf16 %v137_v26, %v136_v25  ;;  %v231_v28 = vld [vmem:[%s417_s2] ss:$0 sm:$0xff] }
  0x1a   :  { %v234_v33 = vld [vmem:[%s419_s4] ss:$0 sm:$0xff] }
  0x1c   :  { %299 = vmatpush3.bf16.msra.mxu1 %v298_v9 }
  0x1d   :  { %300 = vmatprep.subr.bf16.mxu1 %v357_v1 }
  0x20   :  { %302 = vmatpush3.bf16.msra.mxu1 %v301_v12 }
  0x21   :  { %303 = vmatprep.subr.bf16.mxu1 %v357_v1 }
  0x24   :  { %305 = vmatpush3.bf16.msra.mxu1 %v304_v15 }
  0x25   :  { %306 = vmatprep.subr.bf16.mxu1 %v357_v1 }
  0x28   :  { %308 = vmatpush3.bf16.msra.mxu1 %v307_v18 }
  0x29   :  { %309 = vmatprep.subr.bf16.mxu1 %v357_v1 }
  0x2c   :  { %311 = vmatpush3.bf16.msra.mxu1 %v310_v21 }
  0x2d   :  { %312 = vmatprep.subr.bf16.mxu1 %v357_v1 }
  0x30   :  { %314 = vmatpush3.bf16.msra.mxu1 %v313_v24 }
  0x31   :  { %315 = vmatprep.subr.bf16.mxu1 %v357_v1 }
  0x34   :  { %317 = vmatpush3.bf16.msra.mxu1 %v316_v27 }
  0xe9   :  { %v117_v29 = vpop.f32.mrb[0].mxu0 }
  0xea   :  { %v118_v30 = vadd.f32 %v231_v28, %v117_v29  ;;  %v258_v31 = vpop.f32.mrb[1].mxu0 }
  0xec   :  { %v121_v32 = vmax.f32 %v118_v30, 0.0 }
  0xee   :  { %292 = vmatmul.mubr.f32.vlgmr.msra.gmra.mrb[0].mxu1 %v121_v32 }
 0x1c1   :  { %v211_v34 = vpop.f32.mrb[0].mxu1 }
 0x1c2   :  { %v212_v35 = vadd.f32 %v234_v33, %v211_v34  ;;  %v293_v36 = vpop.f32.mrb[1].mxu1 }
 0x1c4   :  { %215 = vmax.xlane.f32.xlu0 %v212_v35 }
 0x251   :  { %v216_v37 = vpop.xlane.xlu0 %215 }
 0x252   :  { %v217_v38 = vsub.f32 %v212_v35, %v216_v37 }
 0x254   :  { %v218_v39 = vmul.f32 1.442695, %v217_v38 }
 0x256   :  { %324 = vpow2.f32 %v218_v39 }
 0x260   :  { %v325_v40 = vpop.eup %324 }
 0x261   :  { %220 = vadd.xlane.f32.xlu0 %v325_v40 }
 0x2ee   :  { %v221_v41 = vpop.xlane.xlu0 %220 }
 0x2ef   :  { %326 = vrcp.f32 %v221_v41 }
 0x2f9   :  { %v327_v42 = vpop.eup %326 }
 0x2fa   :  { %v223_v43 = vmul.f32 %v327_v42, %v325_v40 }
 0x2fc   :  { %225 = vst.msk [vmem:[%s420_s5] sm:$0xff] %vm224_vm3, %v223_v43 }
 0x2fd   :  { %230 = vsyncpa [#allocation3], 1 }

</bundles_post_ra>
